<compile_context>
chip_gen: v5e
topology: v5e:2x2
jax: 0.10.0
libtpu: 0.0.40
codegen_flags: <defaults>
</compile_context>

<pallas_src>
import functools
import math

import jax
import jax.numpy as jnp
from jax import lax
from jax.experimental import pallas as pl
from jax.experimental.pallas import tpu as pltpu


def _memory_unit_kernel(x_ref, w_ref, out_ref, *, shrink_thres: float,
                        n_tokens: int):
    # x_ref: (bn, C)   w_ref: (M, C)   out_ref: (bn, C)
    bn = x_ref.shape[0]
    x = x_ref[...]
    w = w_ref[...]

    # s = x @ W.T -> (bn, M); contract over C.  Native operand dtypes (bf16 OK),
    # f32 accumulation on the MXU.
    s = lax.dot_general(
        x, w, (((1,), (1,)), ((), ())), preferred_element_type=jnp.float32
    )

    # Mask out-of-range tail tokens (grid need not divide N): zero logits keep
    # everything finite; those rows are dropped by the masked output store.
    tok = pl.program_id(0) * bn + lax.broadcasted_iota(jnp.int32, (bn, 1), 0)
    s = jnp.where(tok < n_tokens, s, 0.0)

    # Softmax over the memory dim (axis 1).  Exact division: the kernel is
    # HBM-bound, so VALU/EUP slack is free and accuracy matches the reference.
    s = s - jnp.max(s, axis=1, keepdims=True)
    e = jnp.exp(s)
    att = e / jnp.sum(e, axis=1, keepdims=True)

    if shrink_thres > 0.0:
        # hard_shrink_relu: relu(a - lambd) * a / (|a - lambd| + eps)
        shifted = att - shrink_thres
        att = jnp.maximum(shifted, 0.0) * att / (jnp.abs(shifted) + 1e-12)
        # F.normalize(p=1, dim=1): att >= 0 after the relu-based shrink, so
        # sum(att) == sum(|att|); the redundant abs is skipped (keep ordering!).
        att = att / jnp.maximum(jnp.sum(att, axis=1, keepdims=True), 1e-12)

    # out = att @ W -> (bn, C); contract over M, written straight to the
    # (bn, C) output tile (same layout as the input, no wrapper transpose).
    out = lax.dot_general(
        att.astype(w.dtype), w, (((1,), (0,)), ((), ())),
        preferred_element_type=jnp.float32,
    )
    out_ref[...] = out.astype(out_ref.dtype)


def _round_up(v, m):
    return ((v + m - 1) // m) * m


def memory_unit_forward(x, weight, shrink_thres=0.0025, block_n=4096):
    """x: (N, C) [= NHW x fea_dim], weight: (M, C) -> dict like the torch module."""
    N, C = x.shape
    M, Cw = weight.shape
    assert C == Cw

    # Token tile on the sublane axis: multiple of 8, no larger than (rounded) N.
    bn = max(8, min((int(block_n) // 8) * 8, _round_up(N, 8)))
    # Prefer >= 2 grid steps so the "parallel" token axis can be split across
    # both TensorCores on v7x; negligible cost on single-TC v5e/v6e.
    if N > 8 and pl.cdiv(N, bn) < 2:
        bn = max(8, _round_up(pl.cdiv(N, 2), 8))
    grid = pl.cdiv(N, bn)

    kernel = functools.partial(
        _memory_unit_kernel, shrink_thres=float(shrink_thres), n_tokens=N
    )

    out = pl.pallas_call(
        kernel,
        out_shape=jax.ShapeDtypeStruct((N, C), x.dtype),
        grid_spec=pltpu.PrefetchScalarGridSpec(
            num_scalar_prefetch=0,
            grid=(grid,),
            in_specs=[
                pl.BlockSpec((bn, C), lambda i: (i, 0)),  # token tile, native layout
                pl.BlockSpec((M, C), lambda i: (0, 0)),   # full memory weight (~2 KB)
            ],
            out_specs=pl.BlockSpec((bn, C), lambda i: (i, 0)),
        ),
        compiler_params=pltpu.CompilerParams(
            dimension_semantics=("parallel",),
        ),
    )(x, weight)

    return {"output": out, "att": None, "sem_attn": weight}


def _reference_forward(x, weight, shrink_thres=0.0025):
    s = x @ weight.T
    att = jax.nn.softmax(s, axis=1)
    if shrink_thres > 0.0:
        shifted = att - shrink_thres
        att = jnp.maximum(shifted, 0.0) * att / (jnp.abs(shifted) + 1e-12)
        att = att / jnp.maximum(jnp.sum(jnp.abs(att), axis=1, keepdims=True), 1e-12)
    return att @ weight


if __name__ == "__main__":
    # Module hyper-params (mem_dim = ptt_num * num_cls * part_num)
    ptt_num, num_cls, part_num = 2, 4, 2
    fea_dim = 32
    mem_dim = ptt_num * num_cls * part_num  # 16
    shrink_thres = 0.0025

    # Input is "NHW x C": batch=2, H=8, W=8 -> N = 128 tokens
    N = 2 * 8 * 8

    key = jax.random.PRNGKey(0)
    k_x, k_w = jax.random.split(key)

    # Deterministic init matching reset_parameters: uniform(-stdv, stdv)
    stdv = 1.0 / math.sqrt(fea_dim)
    weight = jax.random.uniform(
        k_w, (mem_dim, fea_dim), minval=-stdv, maxval=stdv, dtype=jnp.float32
    )
    x = jax.random.normal(k_x, (N, fea_dim), dtype=jnp.float32)

    result = memory_unit_forward(x, weight, shrink_thres=shrink_thres)
    out = jax.block_until_ready(result["output"])

    ref = _reference_forward(x, weight, shrink_thres=shrink_thres)
    assert out.shape == (N, fea_dim)
    assert jnp.allclose(out, ref, atol=2e-3, rtol=2e-3), "mismatch vs JAX reference"

    # Ragged token count (not a multiple of the tile) exercises the in-kernel
    # tail-mask path (no padded HBM copy anymore).
    N2 = 100
    x2 = jax.random.normal(jax.random.PRNGKey(1), (N2, fea_dim), dtype=jnp.float32)
    out2 = jax.block_until_ready(
        memory_unit_forward(x2, weight, shrink_thres=shrink_thres)["output"]
    )
    ref2 = _reference_forward(x2, weight, shrink_thres=shrink_thres)
    assert out2.shape == (N2, fea_dim)
    assert jnp.allclose(out2, ref2, atol=2e-3, rtol=2e-3), "ragged-N mismatch"

    # shrink_thres == 0 branch (plain softmax attention) also supported.
    out3 = jax.block_until_ready(
        memory_unit_forward(x, weight, shrink_thres=0.0)["output"]
    )
    ref3 = _reference_forward(x, weight, shrink_thres=0.0)
    assert jnp.allclose(out3, ref3, atol=2e-3, rtol=2e-3), "no-shrink mismatch"

    print("KERNEL_OK")
</pallas_src>

<mosaic_0001>
module attributes {stable_mosaic.version = 11 : i64} {
  func.func @_memory_unit_kernel(%arg0: i32, %arg1: memref<64x32xf32, #tpu.memory_space<vmem>>, %arg2: memref<16x32xf32, #tpu.memory_space<vmem>>, %arg3: memref<64x32xf32, #tpu.memory_space<vmem>>) attributes {dimension_semantics = [#tpu.dimension_semantics<parallel>], iteration_bounds = array<i64: 2>, scalar_prefetch = 0 : i64, scratch_operands = 0 : i64, tpu.core_type = #tpu.core_type<tc>, window_params = [{transform_indices = @transform_0, window_bounds = array<i64: 64, 32>}, {pipeline_mode = #tpu.pipeline_mode<synchronous>, transform_indices = @transform_1, window_bounds = array<i64: 16, 32>}, {transform_indices = @transform_2, window_bounds = array<i64: 64, 32>}]} {
    %c0 = arith.constant 0 : index
    %c0_0 = arith.constant 0 : index
    %0 = vector.load %arg1[%c0, %c0_0] : memref<64x32xf32, #tpu.memory_space<vmem>>, vector<64x32xf32>
    %c0_1 = arith.constant 0 : index
    %c0_2 = arith.constant 0 : index
    %1 = vector.load %arg2[%c0_1, %c0_2] : memref<16x32xf32, #tpu.memory_space<vmem>>, vector<16x32xf32>
    %cst = arith.constant dense<0.000000e+00> : vector<64x16xf32>
    %2 = tpu.matmul %0, %1, %cst {dimension_numbers = #tpu.dot_dimension_numbers<[1], [1], [0], [0], [0, 0, 1, 0], [], []>} : vector<64x32xf32>, vector<16x32xf32>, vector<64x16xf32> -> vector<64x16xf32>
    %c64_i32 = arith.constant 64 : i32
    %3 = arith.muli %arg0, %c64_i32 : i32
    %4 = tpu.iota {dimensions = array<i32: 0>} : vector<64x1xi32>
    %5 = vector.broadcast %3 : i32 to vector<64x1xi32>
    %6 = arith.addi %5, %4 : vector<64x1xi32>
    %c128_i32 = arith.constant 128 : i32
    %7 = vector.broadcast %c128_i32 : i32 to vector<64x1xi32>
    %8 = arith.cmpi slt, %6, %7 : vector<64x1xi32>
    %cst_3 = arith.constant 0.000000e+00 : f32
    %9 = vector.shape_cast %8 : vector<64x1xi1> to vector<64x1xi1>
    %10 = vector.broadcast %9 : vector<64x1xi1> to vector<64x16xi1>
    %11 = vector.broadcast %cst_3 : f32 to vector<64x16xf32>
    %12 = arith.select %10, %2, %11 : vector<64x16xi1>, vector<64x16xf32>
    %cst_4 = arith.constant dense<0xFF800000> : vector<64xf32>
    %13 = vector.multi_reduction <maximumf>, %12, %cst_4 [1] : vector<64x16xf32> to vector<64xf32>
    %14 = vector.shape_cast %13 : vector<64xf32> to vector<64x1xf32>
    %15 = vector.broadcast %14 : vector<64x1xf32> to vector<64x16xf32>
    %16 = arith.subf %12, %15 : vector<64x16xf32>
    %17 = math.exp %16 : vector<64x16xf32>
    %cst_5 = arith.constant dense<0.000000e+00> : vector<64xf32>
    %18 = vector.multi_reduction <add>, %17, %cst_5 [1] : vector<64x16xf32> to vector<64xf32>
    %19 = vector.shape_cast %18 : vector<64xf32> to vector<64x1xf32>
    %20 = vector.broadcast %19 : vector<64x1xf32> to vector<64x16xf32>
    %21 = arith.divf %17, %20 : vector<64x16xf32>
    %cst_6 = arith.constant 2.500000e-03 : f32
    %22 = vector.broadcast %cst_6 : f32 to vector<64x16xf32>
    %23 = arith.subf %21, %22 : vector<64x16xf32>
    %cst_7 = arith.constant 0.000000e+00 : f32
    %24 = vector.broadcast %cst_7 : f32 to vector<64x16xf32>
    %25 = arith.maximumf %23, %24 : vector<64x16xf32>
    %26 = arith.mulf %25, %21 : vector<64x16xf32>
    %27 = math.absf %23 : vector<64x16xf32>
    %cst_8 = arith.constant 9.99999996E-13 : f32
    %28 = vector.broadcast %cst_8 : f32 to vector<64x16xf32>
    %29 = arith.addf %27, %28 : vector<64x16xf32>
    %30 = arith.divf %26, %29 : vector<64x16xf32>
    %cst_9 = arith.constant dense<0.000000e+00> : vector<64xf32>
    %31 = vector.multi_reduction <add>, %30, %cst_9 [1] : vector<64x16xf32> to vector<64xf32>
    %32 = vector.shape_cast %31 : vector<64xf32> to vector<64x1xf32>
    %cst_10 = arith.constant 9.99999996E-13 : f32
    %33 = vector.broadcast %cst_10 : f32 to vector<64x1xf32>
    %34 = arith.maximumf %32, %33 : vector<64x1xf32>
    %35 = vector.broadcast %34 : vector<64x1xf32> to vector<64x16xf32>
    %36 = arith.divf %30, %35 : vector<64x16xf32>
    %cst_11 = arith.constant dense<0.000000e+00> : vector<64x32xf32>
    %37 = tpu.matmul %36, %1, %cst_11 {dimension_numbers = #tpu.dot_dimension_numbers<[1], [0], [0], [1], [0, 0, 1, 1], [], []>} : vector<64x16xf32>, vector<16x32xf32>, vector<64x32xf32> -> vector<64x32xf32>
    %c0_12 = arith.constant 0 : index
    %c0_13 = arith.constant 0 : index
    %38 = vector.load %arg3[%c0_12, %c0_13] : memref<64x32xf32, #tpu.memory_space<vmem>>, vector<64x32xf32>
    tpu.vector_store %arg3[%c0_12, %c0_13], %37 {strides = array<i32>} : memref<64x32xf32, #tpu.memory_space<vmem>>, vector<64x32xf32>,
    return
  }
  func.func @transform_0(%arg0: i32) -> (i32, i32) {
    %c0_i32 = arith.constant 0 : i32
    %c0_i32_0 = arith.constant 0 : i32
    return %arg0, %c0_i32 : i32, i32
  }
  func.func @transform_1(%arg0: i32) -> (i32, i32) {
    %c0_i32 = arith.constant 0 : i32
    %c0_i32_0 = arith.constant 0 : i32
    %c0_i32_1 = arith.constant 0 : i32
    return %c0_i32, %c0_i32_0 : i32, i32
  }
  func.func @transform_2(%arg0: i32) -> (i32, i32) {
    %c0_i32 = arith.constant 0 : i32
    %c0_i32_0 = arith.constant 0 : i32
    return %arg0, %c0_i32 : i32, i32
  }
}

</mosaic_0001>

<bundles_post_ra>
// kernel: tpu_custom_call.1
= control target key start
LH: loop header
LB: loop body
LE: loop exit
PB: predicated region body
PF: predicated region fallthrough
CT: control target
= control target key end

     0   :  { %s1051_s9 = smov 0   ;;  %s1521_s0 = inlined_call_operand.vmem [shape: f32[128,32], index: 0, kind: input, shape index: {}]   ;;  %s1522_s1 = inlined_call_operand.vmem [shape: f32[16,32], index: 1, kind: input, shape index: {}]   ;;  %s1523_s2 = inlined_call_operand.vmem [shape: f32[128,32], index: 2, kind: output, shape index: {}]  }
   0x1 LB: > { %s914_s10 = sadd.s32 4294967295, %s1034_s9   ;;  %p918_p0 = scmp.ge.s32.totalorder %s1034_s9, 1  ;;  %s1034_s9 = sphi %s1051_s9, %s12_s9  }
   0x2   : > { %p113_p1 = scmp.lt.s32.totalorder %s1034_s9, 3 }
   0x4   : > { %p114_p2 = pnand %p918_p0, %p113_p1 }
   0x5   : > { %s919_s13 = sshll.u32 (!%p114_p2), %s914_s10, 3  ;;  %s933_s20 = sshll.u32 (!%p114_p2), %s914_s10, 6 }
   0x6   : > { %117 = sbr.rel (%p114_p2) target bundleno = 753 (0x2f1), region = 28  ;;  %p136_p3 = scmp.lt.s32.totalorder (!%p114_p2), %s919_s13, 15 }
   0xb   : > { %v156_v0 = vld [vmem:[%s1522_s1 + $0x8] sm:$0xff]  ;;  %vm157_vm0 = vcmask 261120   ;;  %v155_v1 = vld [vmem:[%s1522_s1] sm:$0xff]  ;;  %s1557_s13 = smov (!%p136_p3, %s919_s13), 15  ;;  %v230_v10 = vlaneseq  ;;  %v239_v12 = vstv %s933_s20  ;;  %vm280_vm2 = vcmask 130048  }
   0xc   : > { %923 = vmatpush.xpose.msk.msra.mxu0 %vm157_vm0, %v156_v0  ;;  %952 = vmatpush.xpose.msk.msra.mxu2 %vm157_vm0, %v156_v0  ;;  %s920_s16 = sshll.u32 %s1557_s13, 3 }
   0xd   : > { %823 = vmatpush.msra.mxu1 %v156_v0  ;;  %954 = vmatpush.msra.mxu3 %v156_v0  ;;  %s139_s19 = scalar_lea.vmem %s1521_s0, %s920_s16  ;;  %v231_v11 = vshrl.u32 %v230_v10, 7  ;;  %s145_s23 = scalar_lea.vmem %s1523_s2, %s920_s16 }
   0xe   : > { %v147_v2 = vld [vmem:[%s139_s19] sm:$0xff]  ;;  %v148_v4 = vld [vmem:[%s139_s19 + $0x8] sm:$0xff]  ;;  %v153_v6 = vld [vmem:[%s139_s19 + $0x30] sm:$0xff] }
   0xf   : > { %824 = vmatpush.msra.mxu1 %v155_v1  ;;  %955 = vmatpush.msra.mxu3 %v155_v1  ;;  %v151_v3 = vld [vmem:[%s139_s19 + $0x20] sm:$0xff]  ;;  %v152_v5 = vld [vmem:[%s139_s19 + $0x28] sm:$0xff]  ;;  %v149_v7 = vld [vmem:[%s139_s19 + $0x10] sm:$0xff]  ;;  %v240_v13 = vadd.s32 %v239_v12, %v231_v11  ;;  %v232_v14 = vadd.s32 8, %v231_v11  ;;  %v236_v19 = vadd.s32 40, %v231_v11  ;;  %v233_v23 = vadd.s32 16, %v231_v11 }
  0x10   : > { %924 = vmatpush.xpose.msk.msra.mxu0 %vm157_vm0, %v155_v1  ;;  %953 = vmatpush.xpose.msk.msra.mxu2 %vm157_vm0, %v155_v1  ;;  %v154_v8 = vld [vmem:[%s139_s19 + $0x38] sm:$0xff]  ;;  %v237_v27 = vadd.s32 48, %v231_v11  ;;  %v234_v33 = vadd.s32 24, %v231_v11  ;;  %v235_v34 = vadd.s32 32, %v231_v11  ;;  %v238_v36 = vadd.s32 56, %v231_v11 }
  0x11   : > { %v150_v9 = vld [vmem:[%s139_s19 + $0x18] sm:$0xff]  ;;  %vm248_vm1 = vcmp.lt.s32.totalorder %v240_v13, 128  ;;  %v241_v18 = vadd.s32 %v239_v12, %v232_v14  ;;  %v245_v22 = vadd.s32 %v239_v12, %v236_v19  ;;  %v242_v26 = vadd.s32 %v239_v12, %v233_v23 }
  0x12   : > { %v246_v32 = vadd.s32 %v239_v12, %v237_v27  ;;  %v243_v37 = vadd.s32 %v239_v12, %v234_v33  ;;  %v244_v38 = vadd.s32 %v239_v12, %v235_v34  ;;  %v247_v43 = vadd.s32 %v239_v12, %v238_v36 }
  0x13   : > { %925 = vmatmul.msk.f32.vlgmr.msra.gmra.mxu0 %vm157_vm0, %v147_v2  ;;  %929 = vmatmul.msk.f32.vlgmr.msra.gmra.mxu2 %vm157_vm0, %v151_v3  ;;  %vm249_vm3 = vcmp.lt.s32.totalorder %v241_v18, 128  ;;  %vm253_vm4 = vcmp.lt.s32.totalorder %v245_v22, 128  ;;  %vm250_vm5 = vcmp.lt.s32.totalorder %v242_v26, 128 }
  0x14   : > { %vm254_vm6 = vcmp.lt.s32.totalorder %v246_v32, 128  ;;  %vm251_vm7 = vcmp.lt.s32.totalorder %v243_v37, 128  ;;  %vm252_vm8 = vcmp.lt.s32.totalorder %v244_v38, 128  ;;  %vm255_vm9 = vcmp.lt.s32.totalorder %v247_v43, 128 }
  0x1b   : > { %926 = vmatmul.msk.f32.gmra.mxu0 %vm157_vm0, %v148_v4  ;;  %930 = vmatmul.msk.f32.gmra.mxu2 %vm157_vm0, %v152_v5 }
  0x23   : > { %931 = vmatmul.msk.f32.gmra.mxu2 %vm157_vm0, %v153_v6  ;;  %927 = vmatmul.msk.f32.gmra.mxu0 %vm157_vm0, %v149_v7 }
  0x2b   : > { %932 = vmatmul.msk.f32.gmra.mxu2 %vm157_vm0, %v154_v8  ;;  %928 = vmatmul.msk.f32.gmra.mxu0 %vm157_vm0, %v150_v9 }
  0x90   : > { %v205_v15 = vpop.f32.mrf.mxu0 }
  0x91   : > { %v272_v16 = vsel %vm248_vm1, %v205_v15, 0.0 }
  0x92   : > { %v281_v17 = vsel %vm280_vm2, %v272_v16, -inf }
  0x93   : > { %282 = vmax.xlane.f32.xlu0 %v281_v17 }
  0x96   : > { %v217_v20 = vpop.f32.mrf.mxu2 }
  0x97   : > { %v276_v46 = vsel %vm252_vm8, %v217_v20, 0.0 }
  0x98   : > { %v208_v21 = vpop.f32.mrf.mxu0  ;;  %v293_v51 = vsel %vm280_vm2, %v276_v46, -inf }
  0x99   : > { %v273_v24 = vsel %vm249_vm3, %v208_v21, 0.0 }
  0x9a   : > { %v284_v25 = vsel %vm280_vm2, %v273_v24, -inf }
  0x9b   : > { %285 = vmax.xlane.f32.xlu0 %v284_v25 }
  0x9e   : > { %v220_v28 = vpop.f32.mrf.mxu2 }
  0x9f   : > { %v277_v29 = vsel %vm253_vm4, %v220_v28, 0.0 }
  0xa0   : > { %v296_v30 = vsel %vm280_vm2, %v277_v29, -inf  ;;  %v211_v31 = vpop.f32.mrf.mxu0 }
  0xa1   : > { %297 = vmax.xlane.f32.xlu1 %v296_v30  ;;  %v274_v35 = vsel %vm250_vm5, %v211_v31, 0.0 }
  0xa2   : > { %v287_v40 = vsel %vm280_vm2, %v274_v35, -inf }
  0xa6   : > { %v223_v39 = vpop.f32.mrf.mxu2 }
  0xa7   : > { %v278_v41 = vsel %vm254_vm6, %v223_v39, 0.0 }
  0xa8   : > { %v299_v42 = vsel %vm280_vm2, %v278_v41, -inf  ;;  %v214_v44 = vpop.f32.mrf.mxu0 }
  0xa9   : > { %300 = vmax.xlane.f32.xlu2 %v299_v42  ;;  %288 = vmax.xlane.f32.xlu1 %v287_v40  ;;  %v275_v45 = vsel %vm251_vm7, %v214_v44, 0.0 }
  0xaa   : > { %v290_v49 = vsel %vm280_vm2, %v275_v45, -inf }
  0xae   : > { %v226_v47 = vpop.f32.mrf.mxu2 }
  0xaf   : > { %v279_v48 = vsel %vm255_vm9, %v226_v47, 0.0 }
  0xb0   : > { %v302_v50 = vsel %vm280_vm2, %v279_v48, -inf }
  0xb1   : > { %303 = vmax.xlane.f32.xlu0 %v302_v50  ;;  %294 = vmax.xlane.f32.xlu1 %v293_v51 }
  0xb2   : > { %291 = vmax.xlane.f32.xlu2 %v290_v49 }
 0x106   : > { %v283_v52 = vpop.xlane.xlu0 %282 }
 0x107   : > { %v305_v53 = vsub.f32 %v272_v16, %v283_v52 }
 0x109   : > { %v313_v54 = vmul.f32 1.442695, %v305_v53 }
 0x10b   : > { %964 = vpow2.f32 %v313_v54 }
 0x10e   : > { %v286_v55 = vpop.xlane.xlu0 %285 }
 0x10f   : > { %v306_v56 = vsub.f32 %v273_v24, %v286_v55 }
 0x111   : > { %v1097_v57 = vpop.eup %964  ;;  %v315_v58 = vmul.f32 1.442695, %v306_v56 }
 0x112   : > { %v329_v59 = vsel %vm280_vm2, %v1097_v57, 0.0 }
 0x113   : > { %966 = vpow2.f32 %v315_v58  ;;  %330 = vadd.xlane.f32.xlu2 %v329_v59 }
 0x114   : > { %v298_v60 = vpop.xlane.xlu1 %297 }
 0x115   : > { %v310_v61 = vsub.f32 %v277_v29, %v298_v60 }
 0x117   : > { %v323_v62 = vmul.f32 1.442695, %v310_v61 }
 0x119   : > { %v1101_v63 = vpop.eup %966  ;;  %968 = vpow2.f32 %v323_v62 }
 0x11a   : > { %v332_v0 = vsel %vm280_vm2, %v1101_v63, 0.0 }
 0x11b   : > { %333 = vadd.xlane.f32.xlu0 %v332_v0 }
 0x11c   : > { %v301_v1 = vpop.xlane.xlu2 %300  ;;  %v289_v2 = vpop.xlane.xlu1 %288 }
 0x11d   : > { %v311_v3 = vsub.f32 %v278_v41, %v301_v1  ;;  %v307_v4 = vsub.f32 %v274_v35, %v289_v2 }
 0x11f   : > { %v1105_v5 = vpop.eup %968  ;;  %v325_v6 = vmul.f32 1.442695, %v311_v3  ;;  %v317_v7 = vmul.f32 1.442695, %v307_v4 }
 0x120   : > { %v344_v8 = vsel %vm280_vm2, %v1105_v5, 0.0 }
 0x121   : > { %970 = vpow2.f32 %v325_v6  ;;  %345 = vadd.xlane.f32.xlu1 %v344_v8 }
 0x122   : > { %972 = vpow2.f32 %v317_v7 }
 0x124   : > { %v304_v9 = vpop.xlane.xlu0 %303  ;;  %v295_v10 = vpop.xlane.xlu1 %294 }
 0x125   : > { %v312_v11 = vsub.f32 %v279_v48, %v304_v9  ;;  %v309_v12 = vsub.f32 %v276_v46, %v295_v10  ;;  %v292_v13 = vpop.xlane.xlu2 %291 }
 0x126   : > { %v308_v14 = vsub.f32 %v275_v45, %v292_v13 }
 0x127   : > { %v1109_v15 = vpop.eup %970  ;;  %v327_v16 = vmul.f32 1.442695, %v312_v11  ;;  %v321_v17 = vmul.f32 1.442695, %v309_v12 }
 0x128   : > { %v1111_v18 = vpop.eup %972  ;;  %v319_v19 = vmul.f32 1.442695, %v308_v14  ;;  %v347_v20 = vsel %vm280_vm2, %v1109_v15, 0.0 }
 0x129   : > { %974 = vpow2.f32 %v327_v16  ;;  %348 = vadd.xlane.f32.xlu0 %v347_v20  ;;  %v335_v21 = vsel %vm280_vm2, %v1111_v18, 0.0 }
 0x12a   : > { %976 = vpow2.f32 %v321_v17  ;;  %336 = vadd.xlane.f32.xlu2 %v335_v21 }
 0x12b   : > { %978 = vpow2.f32 %v319_v19 }
 0x12f   : > { %v1117_v22 = vpop.eup %974 }
 0x130   : > { %v1119_v23 = vpop.eup %976  ;;  %v350_v24 = vsel %vm280_vm2, %v1117_v22, 0.0 }
 0x131   : > { %v1123_v25 = vpop.eup %978  ;;  %v341_v26 = vsel %vm280_vm2, %v1119_v23, 0.0 }
 0x132   : > { %342 = vadd.xlane.f32.xlu0 %v341_v26  ;;  %351 = vadd.xlane.f32.xlu2 %v350_v24  ;;  %v338_v27 = vsel %vm280_vm2, %v1123_v25, 0.0 }
 0x133   : > { %339 = vadd.xlane.f32.xlu1 %v338_v27 }
 0x186   : > { %v331_v28 = vpop.xlane.xlu2 %330 }
 0x187   : > { %980 = vrcp.f32 %v331_v28  ;;  %v364_v33 = vand.u32 2147483648, %v331_v28  ;;  %v362_v35 = vand.u32 2147483647, %v331_v28  ;;  %vm358_vm11 = vweird.f32 %v331_v28 }
 0x189   : > { %v365_v39 = vor.u32 1.1754944e-38, %v364_v33  ;;  %vm363_vm13 = vcmp.eq.f32.partialorder %v362_v35, 8.507059e+37 }
 0x18d   : > { %v981_v29 = vpop.eup %980 }
 0x18e   : > { %v354_v30 = vmul.f32 %v981_v29, %v331_v28  ;;  %v334_v31 = vpop.xlane.xlu0 %333  ;;  %vm359_vm10 = vweird.f32 %v981_v29 }
 0x18f   : > { %982 = vrcp.f32 %v334_v31  ;;  %vm360_vm12 = vmor %vm358_vm11, %vm359_vm10  ;;  %v377_v52 = vand.u32 2147483647, %v334_v31  ;;  %v379_v53 = vand.u32 2147483648, %v334_v31  ;;  %vm373_vm15 = vweird.f32 %v334_v31 }
 0x190   : > { %v355_v32 = vsub.f32 1.0, %v354_v30 }
 0x191   : > { %vm378_vm3 = vcmp.eq.f32.partialorder %v377_v52, 8.507059e+37  ;;  %v380_v60 = vor.u32 1.1754944e-38, %v379_v53 }
 0x192   : > { %v356_v34 = vmul.f32 %v981_v29, %v355_v32 }
 0x194   : > { %v357_v36 = vadd.f32 %v981_v29, %v356_v34  ;;  %v1129_v37 = vpop.xlane.xlu1 %345 }
 0x195   : > { %v983_v38 = vpop.eup %982  ;;  %984 = vrcp.f32 %v1129_v37  ;;  %v437_v61 = vand.u32 2147483647, %v1129_v37  ;;  %v439_v62 = vand.u32 2147483648, %v1129_v37  ;;  %vm433_vm4 = vweird.f32 %v1129_v37 }
 0x196   : > { %v369_v40 = vmul.f32 %v983_v38, %v334_v31  ;;  %v361_v41 = vsel %vm360_vm12, %v981_v29, %v357_v36  ;;  %vm374_vm14 = vweird.f32 %v983_v38 }
 0x197   : > { %v366_v42 = vsel %vm363_vm13, %v365_v39, %v361_v41  ;;  %vm1143_vm1 = vmor %vm373_vm15, %vm374_vm14  ;;  %v440_v13 = vor.u32 1.1754944e-38, %v439_v62  ;;  %vm1177_vm7 = vcmp.eq.f32.partialorder %v437_v61, 8.507059e+37 }
 0x198   : > { %v370_v43 = vsub.f32 1.0, %v369_v40  ;;  %v367_v44 = vmul.f32 %v1097_v57, %v366_v42 }
 0x19a   : > { %v371_v45 = vmul.f32 %v983_v38, %v370_v43  ;;  %v934_v48 = vadd.f32 -0.0025, %v367_v44 }
 0x19b   : > { %v1133_v46 = vpop.eup %984 }
 0x19c   : > { %v1135_v47 = vpop.xlane.xlu0 %348  ;;  %v372_v50 = vadd.f32 %v983_v38, %v371_v45  ;;  %v429_v51 = vmul.f32 %v1133_v46, %v1129_v37  ;;  %v497_v54 = vand.u32 2147483647, %v934_v48  ;;  %v481_v3 = vmax.f32 %v934_v48, 0.0 }
 0x19d   : > { %986 = vrcp.f32 %v1135_v47  ;;  %v1138_v49 = vpop.xlane.xlu2 %336  ;;  %v452_v2 = vand.u32 2147483647, %v1135_v47  ;;  %v454_v4 = vand.u32 2147483648, %v1135_v47  ;;  %vm434_vm5 = vweird.f32 %v1133_v46 }
 0x19e   : > { %988 = vrcp.f32 %v1138_v49  ;;  %v430_v56 = vsub.f32 1.0, %v429_v51  ;;  %v1147_v57 = vadd.f32 1e-12, %v497_v54  ;;  %v376_v58 = vsel %vm1143_vm1, %v983_v38, %v372_v50  ;;  %vm1215_vm14 = vmor %vm433_vm4, %vm434_vm5 }
 0x19f   : > { %v394_v7 = vand.u32 2147483648, %v1138_v49  ;;  %v381_v9 = vsel %vm378_vm3, %v380_v60, %v376_v58  ;;  %vm448_vm6 = vweird.f32 %v1135_v47  ;;  %v392_v20 = vand.u32 2147483647, %v1138_v49 }
 0x1a0   : > { %990 = vrcp.f32 %v1147_v57  ;;  %v431_v10 = vmul.f32 %v1133_v46, %v430_v56  ;;  %v1184_v21 = vmul.f32 %v1101_v63, %v381_v9  ;;  %vm1186_vm8 = vcmp.eq.f32.partialorder %v452_v2, 8.507059e+37 }
 0x1a1   : > { %v455_v26 = vor.u32 1.1754944e-38, %v454_v4  ;;  %v1190_v27 = vor.u32 1.1754944e-38, %v394_v7  ;;  %v489_v28 = vmul.f32 %v481_v3, %v367_v44  ;;  %vm518_vm10 = vweird.f32 %v1147_v57 }
 0x1a2   : > { %v432_v30 = vadd.f32 %v1133_v46, %v431_v10  ;;  %vm388_vm11 = vweird.f32 %v1138_v49  ;;  %v522_v32 = vand.u32 2147483647, %v1147_v57  ;;  %v524_v35 = vand.u32 2147483648, %v1147_v57 }
 0x1a3   : > { %v1151_v59 = vpop.eup %986  ;;  %v1207_v36 = vadd.f32 -0.0025, %v1184_v21  ;;  %vm1235_vm3 = vcmp.eq.f32.partialorder %v392_v20, 8.507059e+37 }
 0x1a4   : > { %v1155_v0 = vpop.eup %988  ;;  %v444_v1 = vmul.f32 %v1151_v59, %v1135_v47  ;;  %vm449_vm9 = vweird.f32 %v1151_v59  ;;  %v436_v47 = vsel %vm1215_vm14, %v1133_v46, %v432_v30  ;;  %vm1249_vm4 = vcmp.eq.f32.partialorder %v522_v32, 8.507059e+37 }
 0x1a5   : > { %v384_v6 = vmul.f32 %v1155_v0, %v1138_v49  ;;  %v1165_v8 = vpop.xlane.xlu0 %342  ;;  %v1175_v14 = vpop.xlane.xlu2 %351  ;;  %vm389_vm12 = vweird.f32 %v1155_v0  ;;  %vm1227_vm15 = vmor %vm448_vm6, %vm449_vm9  ;;  %v498_v48 = vand.u32 2147483647, %v1207_v36  ;;  %v441_v46 = vsel %vm1177_vm7, %v440_v13, %v436_v47 }
 0x1a6   : > { %v445_v11 = vsub.f32 1.0, %v444_v1  ;;  %992 = vrcp.f32 %v1165_v8  ;;  %v1170_v12 = vpop.xlane.xlu1 %339  ;;  %v991_v29 = vpop.eup %990  ;;  %vm418_vm13 = vweird.f32 %v1165_v8  ;;  %v422_v41 = vand.u32 2147483647, %v1165_v8  ;;  %vm1275_vm7 = vmor %vm388_vm11, %vm389_vm12 }
 0x1a7   : > { %994 = vrcp.f32 %v1170_v12  ;;  %v385_v19 = vsub.f32 1.0, %v384_v6  ;;  %v514_v31 = vmul.f32 %v991_v29, %v1147_v57  ;;  %v424_v42 = vand.u32 2147483648, %v1165_v8 }
 0x1a8   : > { %v446_v17 = vmul.f32 %v1151_v59, %v445_v11  ;;  %996 = vrcp.f32 %v1175_v14  ;;  %v407_v45 = vand.u32 2147483647, %v1170_v12  ;;  %vm519_vm1 = vweird.f32 %v991_v29 }
 0x1a9   : > { %v386_v34 = vmul.f32 %v1155_v0, %v385_v19  ;;  %v515_v43 = vsub.f32 1.0, %v514_v31  ;;  %v409_v58 = vand.u32 2147483648, %v1170_v12  ;;  %v1254_v1 = vadd.f32 1e-12, %v498_v48  ;;  %vm520_vm6 = vmor %vm518_vm10, %vm519_vm1 }
 0x1aa   : > { %v447_v63 = vadd.f32 %v1151_v59, %v446_v17  ;;  %v1263_v2 = vmul.f32 %v1105_v5, %v441_v46  ;;  %vm1279_vm9 = vcmp.eq.f32.partialorder %v422_v41, 8.507059e+37  ;;  %v425_v9 = vor.u32 1.1754944e-38, %v424_v42 }
 0x1ab   : > { %v516_v52 = vmul.f32 %v991_v29, %v515_v43  ;;  %v387_v55 = vadd.f32 %v1155_v0, %v386_v34  ;;  %998 = vrcp.f32 %v1254_v1  ;;  %v410_v19 = vor.u32 1.1754944e-38, %v409_v58 }
 0x1ac   : > { %v1201_v33 = vpop.eup %992  ;;  %v451_v53 = vsel %vm1227_vm15, %v1151_v59, %v447_v63  ;;  %v525_v59 = vor.u32 1.1754944e-38, %v524_v35  ;;  %v939_v16 = vadd.f32 -0.0025, %v1263_v2  ;;  %v469_v20 = vand.u32 2147483648, %v1175_v14 }
 0x1ad   : > { %v1209_v38 = vpop.eup %994  ;;  %v414_v40 = vmul.f32 %v1201_v33, %v1165_v8  ;;  %v517_v62 = vadd.f32 %v991_v29, %v516_v52  ;;  %vm419_vm5 = vweird.f32 %v1201_v33  ;;  %v456_v3 = vsel %vm1186_vm8, %v455_v26, %v451_v53 }
 0x1ae   : > { %v399_v37 = vmul.f32 %v1209_v38, %v1170_v12  ;;  %v1245_v54 = vpop.eup %996  ;;  %vm403_vm8 = vweird.f32 %v1170_v12  ;;  %vm1288_vm10 = vmor %vm418_vm13, %vm419_vm5  ;;  %v1297_v17 = vmul.f32 %v1109_v15, %v456_v3  ;;  %v391_v8 = vsel %vm1275_vm7, %v1155_v0, %v387_v55 }
 0x1af   : > { %v415_v51 = vsub.f32 1.0, %v414_v40  ;;  %v459_v6 = vmul.f32 %v1245_v54, %v1175_v14  ;;  %v521_v7 = vsel %vm520_vm6, %v991_v29, %v517_v62  ;;  %vm404_vm11 = vweird.f32 %v1209_v38 }
 0x1b0   : > { %v400_v56 = vsub.f32 1.0, %v399_v37  ;;  %v526_v10 = vsel %vm1249_vm4, %v525_v59, %v521_v7  ;;  %vm1307_vm12 = vcmp.eq.f32.partialorder %v407_v45, 8.507059e+37  ;;  %v502_v29 = vand.u32 2147483647, %v939_v16  ;;  %vm1341_vm14 = vmor %vm403_vm8, %vm404_vm11 }
 0x1b1   : > { %v416_v61 = vmul.f32 %v1201_v33, %v415_v51  ;;  %v1293_v13 = vmul.f32 %v526_v10, %v489_v28  ;;  %v460_v28 = vsub.f32 1.0, %v459_v6  ;;  %v482_v30 = vmax.f32 %v1207_v36, 0.0  ;;  %v999_v32 = vpop.eup %998 }
 0x1b2   : > { %v401_v49 = vmul.f32 %v1209_v38, %v400_v56  ;;  %v940_v0 = vadd.f32 -0.0025, %v1297_v17  ;;  %v396_v63 = vsel %vm1235_vm3, %v1190_v27, %v391_v8  ;;  %v1321_v34 = vadd.f32 1e-12, %v502_v29 }
 0x1b3   : > { %v417_v4 = vadd.f32 %v1201_v33, %v416_v61  ;;  %v633_v15 = vsel %vm280_vm2, %v1293_v13, 0.0  ;;  %v1324_v35 = vmul.f32 %v1111_v18, %v396_v63  ;;  %v467_v36 = vand.u32 2147483647, %v1175_v14 }
 0x1b4   : > { %634 = vadd.xlane.f32.xlu1 %v633_v15  ;;  %v1330_v40 = vor.u32 1.1754944e-38, %v469_v20  ;;  %v529_v27 = vmul.f32 %v999_v32, %v1254_v1  ;;  %v503_v41 = vand.u32 2147483647, %v940_v0  ;;  %v461_v42 = vmul.f32 %v1245_v54, %v460_v28 }
 0x1b5   : > { %v421_v24 = vsel %vm1288_vm10, %v1201_v33, %v417_v4  ;;  %v402_v33 = vadd.f32 %v1209_v38, %v401_v49  ;;  %vm464_vm13 = vweird.f32 %v1245_v54  ;;  %v537_v43 = vand.u32 2147483647, %v1254_v1 }
 0x1b6   : > { %v426_v31 = vsel %vm1279_vm9, %v425_v9, %v421_v24  ;;  %1000 = vrcp.f32 %v1321_v34  ;;  %v539_v44 = vand.u32 2147483648, %v1254_v1  ;;  %v1346_v37 = vadd.f32 1e-12, %v503_v41 }
 0x1b7   : > { %v1327_v39 = vmul.f32 %v1119_v23, %v426_v31  ;;  %v530_v23 = vsub.f32 1.0, %v529_v27  ;;  %v1349_v45 = vadd.f32 -0.0025, %v1324_v35  ;;  %vm463_vm15 = vweird.f32 %v1175_v14 }
 0x1b8   : > { %v490_v48 = vmul.f32 %v482_v30, %v1184_v21  ;;  %v486_v50 = vmax.f32 %v939_v16, 0.0  ;;  %v406_v12 = vsel %vm1341_vm14, %v1209_v38, %v402_v33  ;;  %vm533_vm1 = vweird.f32 %v1254_v1  ;;  %vm465_vm8 = vmor %vm463_vm15, %vm464_vm13 }
 0x1b9   : > { %v1354_v51 = vadd.f32 -0.0025, %v1327_v39  ;;  %v531_v52 = vmul.f32 %v999_v32, %v530_v23  ;;  %vm534_vm3 = vweird.f32 %v999_v32  ;;  %1002 = vrcp.f32 %v1346_v37 }
 0x1ba   : > { %v462_v47 = vadd.f32 %v1245_v54, %v461_v42  ;;  %vm1362_vm4 = vcmp.eq.f32.partialorder %v467_v36, 8.507059e+37  ;;  %vm1366_vm5 = vcmp.eq.f32.partialorder %v537_v43, 8.507059e+37  ;;  %v487_v55 = vmax.f32 %v940_v0, 0.0  ;;  %vm535_vm6 = vmor %vm533_vm1, %vm534_vm3 }
 0x1bb   : > { %v499_v56 = vand.u32 2147483647, %v1349_v45  ;;  %v532_v38 = vadd.f32 %v999_v32, %v531_v52  ;;  %v540_v58 = vor.u32 1.1754944e-38, %v539_v44  ;;  %v501_v60 = vand.u32 2147483647, %v1354_v51 }
 0x1bc   : > { %v411_v61 = vsel %vm1307_vm12, %v410_v19, %v406_v12  ;;  %v1001_v62 = vpop.eup %1000  ;;  %v494_v1 = vmul.f32 %v486_v50, %v1263_v2  ;;  %v597_v46 = vand.u32 2147483647, %v1321_v34  ;;  %v599_v59 = vand.u32 2147483648, %v1321_v34 }
 0x1bd   : > { %v1377_v3 = vadd.f32 1e-12, %v499_v56  ;;  %v536_v4 = vsel %vm535_vm6, %v999_v32, %v532_v38  ;;  %v589_v6 = vmul.f32 %v1001_v62, %v1321_v34  ;;  %vm593_vm7 = vweird.f32 %v1321_v34 }
 0x1be   : > { %v1381_v7 = vadd.f32 1e-12, %v501_v60  ;;  %v541_v57 = vsel %vm1366_vm5, %v540_v58, %v536_v4  ;;  %v495_v5 = vmul.f32 %v487_v55, %v1297_v17  ;;  %v1388_v2 = vmul.f32 %v1123_v25, %v411_v61 }
 0x1bf   : > { %1004 = vrcp.f32 %v1377_v3  ;;  %v1003_v9 = vpop.eup %1002  ;;  %v1390_v10 = vmul.f32 %v541_v57, %v490_v48  ;;  %v590_v11 = vsub.f32 1.0, %v589_v6  ;;  %v612_v49 = vand.u32 2147483647, %v1346_v37 }
 0x1c0   : > { %1006 = vrcp.f32 %v1381_v7  ;;  %vm1394_vm9 = vcmp.eq.f32.partialorder %v597_v46, 8.507059e+37  ;;  %v600_v19 = vor.u32 1.1754944e-38, %v599_v59  ;;  %v604_v17 = vmul.f32 %v1003_v9, %v1346_v37 }
 0x1c1   : > { %v614_v20 = vand.u32 2147483648, %v1346_v37  ;;  %v636_v25 = vsel %vm280_vm2, %v1390_v10, 0.0  ;;  %v591_v8 = vmul.f32 %v1001_v62, %v590_v11  ;;  %vm594_vm10 = vweird.f32 %v1001_v62 }
 0x1c2   : > { %vm608_vm11 = vweird.f32 %v1346_v37  ;;  %637 = vadd.xlane.f32.xlu2 %v636_v25  ;;  %v605_v24 = vsub.f32 1.0, %v604_v17  ;;  %v483_v26 = vmax.f32 %v1349_v45, 0.0  ;;  %v1409_v28 = vadd.f32 -0.0025, %v1388_v2  ;;  %vm595_vm13 = vmor %vm593_vm7, %vm594_vm10 }
 0x1c3   : > { %v466_v15 = vsel %vm465_vm8, %v1245_v54, %v462_v47  ;;  %v592_v29 = vadd.f32 %v1001_v62, %v591_v8  ;;  %vm1412_vm12 = vcmp.eq.f32.partialorder %v612_v49, 8.507059e+37  ;;  %v485_v30 = vmax.f32 %v1354_v51, 0.0 }
 0x1c4   : > { %v471_v0 = vsel %vm1362_vm4, %v1330_v40, %v466_v15  ;;  %v606_v31 = vmul.f32 %v1003_v9, %v605_v24  ;;  %vm609_vm14 = vweird.f32 %v1003_v9  ;;  %v615_v32 = vor.u32 1.1754944e-38, %v614_v20 }
 0x1c5   : > { %v1005_v63 = vpop.eup %1004  ;;  %v500_v54 = vand.u32 2147483647, %v1409_v28  ;;  %v596_v36 = vsel %vm595_vm13, %v1001_v62, %v592_v29  ;;  %v552_v41 = vand.u32 2147483647, %v1377_v3  ;;  %v1426_v42 = vmul.f32 %v1117_v22, %v471_v0  ;;  %vm610_vm15 = vmor %vm608_vm11, %vm609_vm14 }
 0x1c6   : > { %v1007_v33 = vpop.eup %1006  ;;  %v544_v27 = vmul.f32 %v1005_v63, %v1377_v3  ;;  %v601_v40 = vsel %vm1394_vm9, %v600_v19, %v596_v36  ;;  %v607_v43 = vadd.f32 %v1003_v9, %v606_v31  ;;  %v554_v34 = vand.u32 2147483648, %v1377_v3 }
 0x1c7   : > { %v574_v18 = vmul.f32 %v1007_v33, %v1381_v7  ;;  %v1432_v23 = vmul.f32 %v601_v40, %v494_v1  ;;  %v584_v45 = vand.u32 2147483648, %v1381_v7  ;;  %v508_v48 = vadd.f32 1e-12, %v500_v54 }
 0x1c8   : > { %v545_v44 = vsub.f32 1.0, %v544_v27  ;;  %v611_v50 = vsel %vm610_vm15, %v1003_v9, %v607_v43  ;;  %vm549_vm1 = vweird.f32 %v1005_v63  ;;  %v1438_v51 = vadd.f32 -0.0025, %v1426_v42 }
 0x1c9   : > { %v575_v22 = vsub.f32 1.0, %v574_v18  ;;  %v648_v12 = vsel %vm280_vm2, %v1432_v23, 0.0  ;;  %v616_v52 = vsel %vm1412_vm12, %v615_v32, %v611_v50  ;;  %1008 = vrcp.f32 %v508_v48 }
 0x1ca   : > { %v546_v47 = vmul.f32 %v1005_v63, %v545_v44  ;;  %649 = vadd.xlane.f32.xlu0 %v648_v12  ;;  %v1444_v37 = vmul.f32 %v616_v52, %v495_v5  ;;  %vm579_vm3 = vweird.f32 %v1007_v33  ;;  %v582_v21 = vand.u32 2147483647, %v1381_v7 }
 0x1cb   : > { %v576_v53 = vmul.f32 %v1007_v33, %v575_v22  ;;  %v491_v55 = vmul.f32 %v483_v26, %v1324_v35  ;;  %vm548_vm4 = vweird.f32 %v1377_v3  ;;  %v504_v38 = vand.u32 2147483647, %v1438_v51 }
 0x1cc   : > { %v547_v56 = vadd.f32 %v1005_v63, %v546_v47  ;;  %v651_v58 = vsel %vm280_vm2, %v1444_v37, 0.0  ;;  %vm550_vm5 = vmor %vm548_vm4, %vm549_vm1  ;;  %v555_v60 = vor.u32 1.1754944e-38, %v554_v34  ;;  %vm578_vm6 = vweird.f32 %v1381_v7 }
 0x1cd   : > { %v577_v61 = vadd.f32 %v1007_v33, %v576_v53  ;;  %652 = vadd.xlane.f32.xlu2 %v651_v58  ;;  %vm553_vm7 = vcmp.eq.f32.partialorder %v552_v41, 8.507059e+37  ;;  %vm580_vm9 = vmor %vm578_vm6, %vm579_vm3  ;;  %v585_v1 = vor.u32 1.1754944e-38, %v584_v45  ;;  %v512_v35 = vadd.f32 1e-12, %v504_v38 }
 0x1ce   : > { %v551_v62 = vsel %vm550_vm5, %v1005_v63, %v547_v56  ;;  %v493_v59 = vmul.f32 %v485_v30, %v1327_v39  ;;  %vm583_vm8 = vcmp.eq.f32.partialorder %v582_v21, 8.507059e+37  ;;  %v569_v16 = vand.u32 2147483648, %v508_v48 }
 0x1cf   : > { %v556_v46 = vsel %vm553_vm7, %v555_v60, %v551_v62  ;;  %v581_v3 = vsel %vm580_vm9, %v1007_v33, %v577_v61  ;;  %v1009_v4 = vpop.eup %1008  ;;  %1010 = vrcp.f32 %v512_v35  ;;  %v484_v39 = vmax.f32 %v1409_v28, 0.0 }
 0x1d0   : > { %v1455_v6 = vmul.f32 %v556_v46, %v491_v55  ;;  %v586_v57 = vsel %vm583_vm8, %v585_v1, %v581_v3  ;;  %v559_v9 = vmul.f32 %v1009_v4, %v508_v48  ;;  %vm564_vm10 = vweird.f32 %v1009_v4 }
 0x1d1   : > { %v1457_v5 = vmul.f32 %v586_v57, %v493_v59  ;;  %v567_v17 = vand.u32 2147483647, %v508_v48  ;;  %vm563_vm11 = vweird.f32 %v508_v48  ;;  %v570_v24 = vor.u32 1.1754944e-38, %v569_v16 }
 0x1d2   : > { %v639_v7 = vsel %vm280_vm2, %v1455_v6, 0.0  ;;  %v560_v49 = vsub.f32 1.0, %v559_v9  ;;  %vm565_vm12 = vmor %vm563_vm11, %vm564_vm10  ;;  %v492_v26 = vmul.f32 %v484_v39, %v1388_v2  ;;  %v488_v30 = vmax.f32 %v1438_v51, 0.0 }
 0x1d3   : > { %640 = vadd.xlane.f32.xlu1 %v639_v7  ;;  %v645_v11 = vsel %vm280_vm2, %v1457_v5, 0.0  ;;  %vm568_vm13 = vcmp.eq.f32.partialorder %v567_v17, 8.507059e+37  ;;  %v629_v0 = vand.u32 2147483648, %v512_v35  ;;  %v627_v31 = vand.u32 2147483647, %v512_v35 }
 0x1d4   : > { %v561_v19 = vmul.f32 %v1009_v4, %v560_v49  ;;  %vm623_vm15 = vweird.f32 %v512_v35  ;;  %v496_v33 = vmul.f32 %v488_v30, %v1426_v42 }
 0x1d5   : > { %v1011_v20 = vpop.eup %1010  ;;  %646 = vadd.xlane.f32.xlu2 %v645_v11  ;;  %v630_v2 = vor.u32 1.1754944e-38, %v629_v0  ;;  %vm628_vm3 = vcmp.eq.f32.partialorder %v627_v31, 8.507059e+37 }
 0x1d6   : > { %v562_v25 = vadd.f32 %v1009_v4, %v561_v19  ;;  %v619_v8 = vmul.f32 %v1011_v20, %v512_v35  ;;  %vm624_vm14 = vweird.f32 %v1011_v20 }
 0x1d7   : > { %vm625_vm1 = vmor %vm623_vm15, %vm624_vm14 }
 0x1d8   : > { %v566_v15 = vsel %vm565_vm12, %v1009_v4, %v562_v25  ;;  %v620_v29 = vsub.f32 1.0, %v619_v8 }
 0x1d9   : > { %v571_v14 = vsel %vm568_vm13, %v570_v24, %v566_v15 }
 0x1da   : > { %v1466_v28 = vmul.f32 %v571_v14, %v492_v26  ;;  %v621_v63 = vmul.f32 %v1011_v20, %v620_v29 }
 0x1dc   : > { %v642_v32 = vsel %vm280_vm2, %v1466_v28, 0.0  ;;  %v622_v54 = vadd.f32 %v1011_v20, %v621_v63 }
 0x1dd   : > { %643 = vadd.xlane.f32.xlu0 %v642_v32 }
 0x1de   : > { %v626_v36 = vsel %vm625_vm1, %v1011_v20, %v622_v54 }
 0x1df   : > { %v631_v27 = vsel %vm628_vm3, %v630_v2, %v626_v36 }
 0x1e0   : > { %v1471_v41 = vmul.f32 %v631_v27, %v496_v33 }
 0x1e2   : > { %v654_v40 = vsel %vm280_vm2, %v1471_v41, 0.0 }
 0x1e3   : > { %655 = vadd.xlane.f32.xlu1 %v654_v40 }
 0x227   : > { %v635_v43 = vpop.xlane.xlu1 %634 }
 0x228   : > { %v657_v34 = vmax.f32 %v635_v43, 1e-12 }
 0x22a   : > { %1012 = vrcp.f32 %v657_v34  ;;  %v676_v48 = vand.u32 2147483648, %v657_v34  ;;  %v674_v22 = vand.u32 2147483647, %v657_v34  ;;  %vm670_vm5 = vweird.f32 %v657_v34 }
 0x22c   : > { %v677_v52 = vor.u32 1.1754944e-38, %v676_v48  ;;  %vm675_vm7 = vcmp.eq.f32.partialorder %v674_v22, 8.507059e+37 }
 0x230   : > { %v1013_v18 = vpop.eup %1012 }
 0x231   : > { %v666_v44 = vmul.f32 %v1013_v18, %v657_v34  ;;  %vm671_vm4 = vweird.f32 %v1013_v18 }
 0x232   : > { %vm672_vm6 = vmor %vm670_vm5, %vm671_vm4 }
 0x233   : > { %v667_v45 = vsub.f32 1.0, %v666_v44 }
 0x235   : > { %v668_v50 = vmul.f32 %v1013_v18, %v667_v45  ;;  %v638_v42 = vpop.xlane.xlu2 %637 }
 0x236   : > { %v658_v51 = vmax.f32 %v638_v42, 1e-12 }
 0x237   : > { %v669_v12 = vadd.f32 %v1013_v18, %v668_v50 }
 0x238   : > { %1014 = vrcp.f32 %v658_v51  ;;  %v691_v1 = vand.u32 2147483648, %v658_v51  ;;  %v689_v46 = vand.u32 2147483647, %v658_v51  ;;  %vm685_vm8 = vweird.f32 %v658_v51 }
 0x239   : > { %v673_v47 = vsel %vm672_vm6, %v1013_v18, %v669_v12 }
 0x23a   : > { %v678_v53 = vsel %vm675_vm7, %v677_v52, %v673_v47  ;;  %v692_v57 = vor.u32 1.1754944e-38, %v691_v1  ;;  %vm690_vm11 = vcmp.eq.f32.partialorder %v689_v46, 8.507059e+37 }
 0x23b   : > { %v679_v21 = vmul.f32 %v678_v53, %v1293_v13 }
 0x23d   : > { %942 = vmatmul.msk.f32.vlgmr.msra.gmra.mxu1 %vm280_vm2, %v679_v21  ;;  %v650_v55 = vpop.xlane.xlu0 %649 }
 0x23e   : > { %v1015_v56 = vpop.eup %1014  ;;  %v662_v38 = vmax.f32 %v650_v55, 1e-12 }
 0x23f   : > { %v681_v58 = vmul.f32 %v1015_v56, %v658_v51  ;;  %vm686_vm9 = vweird.f32 %v1015_v56 }
 0x240   : > { %1016 = vrcp.f32 %v662_v38  ;;  %v653_v60 = vpop.xlane.xlu2 %652  ;;  %vm687_vm10 = vmor %vm685_vm8, %vm686_vm9  ;;  %v751_v20 = vand.u32 2147483648, %v662_v38  ;;  %v749_v24 = vand.u32 2147483647, %v662_v38  ;;  %vm745_vm13 = vweird.f32 %v662_v38 }
 0x241   : > { %v682_v61 = vsub.f32 1.0, %v681_v58  ;;  %v663_v62 = vmax.f32 %v653_v60, 1e-12 }
 0x242   : > { %v752_v29 = vor.u32 1.1754944e-38, %v751_v20  ;;  %vm750_vm1 = vcmp.eq.f32.partialorder %v749_v24, 8.507059e+37 }
 0x243   : > { %1018 = vrcp.f32 %v663_v62  ;;  %v683_v35 = vmul.f32 %v1015_v56, %v682_v61  ;;  %v766_v0 = vand.u32 2147483648, %v663_v62  ;;  %vm760_vm3 = vweird.f32 %v663_v62 }
 0x245   : > { %v684_v3 = vadd.f32 %v1015_v56, %v683_v35  ;;  %v767_v34 = vor.u32 1.1754944e-38, %v766_v0 }
 0x246   : > { %v641_v59 = vpop.xlane.xlu1 %640  ;;  %v1017_v4 = vpop.eup %1016 }
 0x247   : > { %v659_v13 = vmax.f32 %v641_v59, 1e-12  ;;  %v741_v9 = vmul.f32 %v1017_v4, %v662_v38  ;;  %v688_v7 = vsel %vm687_vm10, %v1015_v56, %v684_v3  ;;  %vm746_vm12 = vweird.f32 %v1017_v4 }
 0x248   : > { %v693_v11 = vsel %vm690_vm11, %v692_v57, %v688_v7  ;;  %v647_v49 = vpop.xlane.xlu2 %646  ;;  %vm747_vm14 = vmor %vm745_vm13, %vm746_vm12 }
 0x249   : > { %1020 = vrcp.f32 %v659_v13  ;;  %v1019_v16 = vpop.eup %1018  ;;  %v742_v39 = vsub.f32 1.0, %v741_v9  ;;  %v694_v19 = vmul.f32 %v693_v11, %v1390_v10  ;;  %v1478_v17 = vmax.f32 %v647_v49, 1e-12 }
 0x24a   : > { %v756_v25 = vmul.f32 %v1019_v16, %v663_v62  ;;  %vm761_vm15 = vweird.f32 %v1019_v16  ;;  %v764_v10 = vand.u32 2147483647, %v663_v62  ;;  %v706_v40 = vand.u32 2147483648, %v659_v13 }
 0x24b   : > { %943 = vmatmul.msk.f32.gmra.mxu1 %vm280_vm2, %v694_v19  ;;  %v743_v8 = vmul.f32 %v1017_v4, %v742_v39  ;;  %1022 = vrcp.f32 %v1478_v17  ;;  %vm762_vm4 = vmor %vm760_vm3, %vm761_vm15  ;;  %v704_v45 = vand.u32 2147483647, %v659_v13  ;;  %vm700_vm7 = vweird.f32 %v659_v13 }
 0x24c   : > { %v757_v26 = vsub.f32 1.0, %v756_v25  ;;  %vm765_vm5 = vcmp.eq.f32.partialorder %v764_v10, 8.507059e+37  ;;  %v707_v42 = vor.u32 1.1754944e-38, %v706_v40  ;;  %vm730_vm13 = vweird.f32 %v1478_v17 }
 0x24d   : > { %v744_v15 = vadd.f32 %v1017_v4, %v743_v8  ;;  %vm705_vm8 = vcmp.eq.f32.partialorder %v704_v45, 8.507059e+37  ;;  %v734_v57 = vand.u32 2147483647, %v1478_v17  ;;  %v736_v9 = vand.u32 2147483648, %v1478_v17 }
 0x24e   : > { %v758_v30 = vmul.f32 %v1019_v16, %v757_v26 }
 0x24f   : > { %v1021_v14 = vpop.eup %1020  ;;  %v748_v31 = vsel %vm747_vm14, %v1017_v4, %v744_v15  ;;  %v737_v20 = vor.u32 1.1754944e-38, %v736_v9 }
 0x250   : > { %v696_v63 = vmul.f32 %v1021_v14, %v659_v13  ;;  %v644_v32 = vpop.xlane.xlu0 %643  ;;  %v753_v54 = vsel %vm750_vm1, %v752_v29, %v748_v31  ;;  %v759_v2 = vadd.f32 %v1019_v16, %v758_v30  ;;  %vm701_vm6 = vweird.f32 %v1021_v14 }
 0x251   : > { %v660_v36 = vmax.f32 %v644_v32, 1e-12  ;;  %v754_v27 = vmul.f32 %v753_v54, %v1432_v23  ;;  %v1483_v18 = vpop.eup %1022  ;;  %vm702_vm9 = vmor %vm700_vm7, %vm701_vm6  ;;  %vm735_vm7 = vcmp.eq.f32.partialorder %v734_v57, 8.507059e+37 }
 0x252   : > { %v697_v33 = vsub.f32 1.0, %v696_v63  ;;  %v763_v43 = vsel %vm762_vm4, %v1019_v16, %v759_v2  ;;  %v726_v23 = vmul.f32 %v1483_v18, %v1478_v17  ;;  %vm731_vm14 = vweird.f32 %v1483_v18 }
 0x253   : > { %1024 = vrcp.f32 %v660_v36  ;;  %947 = vmatmul.msk.f32.vlgmr.msra.gmra.mxu3 %vm280_vm2, %v754_v27  ;;  %v768_v48 = vsel %vm765_vm5, %v767_v34, %v763_v43  ;;  %v721_v58 = vand.u32 2147483648, %v660_v36  ;;  %v719_v61 = vand.u32 2147483647, %v660_v36  ;;  %vm732_vm3 = vmor %vm730_vm13, %vm731_vm14 }
 0x254   : > { %v698_v44 = vmul.f32 %v1021_v14, %v697_v33  ;;  %v769_v52 = vmul.f32 %v768_v48, %v1444_v37  ;;  %v727_v56 = vsub.f32 1.0, %v726_v23  ;;  %vm715_vm11 = vweird.f32 %v660_v36 }
 0x255   : > { %v722_v46 = vor.u32 1.1754944e-38, %v721_v58  ;;  %vm720_vm15 = vcmp.eq.f32.partialorder %v719_v61, 8.507059e+37 }
 0x256   : > { %v699_v50 = vadd.f32 %v1021_v14, %v698_v44  ;;  %v656_v22 = vpop.xlane.xlu1 %655  ;;  %v728_v62 = vmul.f32 %v1483_v18, %v727_v56 }
 0x257   : > { %v664_v51 = vmax.f32 %v656_v22, 1e-12 }
 0x258   : > { %v703_v12 = vsel %vm702_vm9, %v1021_v14, %v699_v50  ;;  %v729_v3 = vadd.f32 %v1483_v18, %v728_v62 }
 0x259   : > { %v708_v47 = vsel %vm705_vm8, %v707_v42, %v703_v12  ;;  %v1025_v53 = vpop.eup %1024  ;;  %1026 = vrcp.f32 %v664_v51  ;;  %v781_v13 = vand.u32 2147483648, %v664_v51  ;;  %v779_v49 = vand.u32 2147483647, %v664_v51 }
 0x25a   : > { %v709_v21 = vmul.f32 %v708_v47, %v1455_v6  ;;  %v711_v55 = vmul.f32 %v1025_v53, %v660_v36  ;;  %vm716_vm10 = vweird.f32 %v1025_v53  ;;  %vm775_vm4 = vweird.f32 %v664_v51 }
 0x25b   : > { %948 = vmatmul.msk.f32.gmra.mxu3 %vm280_vm2, %v769_v52  ;;  %vm717_vm12 = vmor %vm715_vm11, %vm716_vm10  ;;  %v733_v39 = vsel %vm732_vm3, %v1483_v18, %v729_v3  ;;  %v782_v19 = vor.u32 1.1754944e-38, %v781_v13  ;;  %vm780_vm6 = vcmp.eq.f32.partialorder %v779_v49, 8.507059e+37 }
 0x25c   : > { %944 = vmatmul.msk.f32.gmra.mxu1 %vm280_vm2, %v709_v21  ;;  %v712_v38 = vsub.f32 1.0, %v711_v55  ;;  %v738_v8 = vsel %vm735_vm7, %v737_v20, %v733_v39 }
 0x25d   : > { %v739_v24 = vmul.f32 %v738_v8, %v1457_v5 }
 0x25e   : > { %v713_v60 = vmul.f32 %v1025_v53, %v712_v38 }
 0x25f   : > { %v1027_v1 = vpop.eup %1026 }
 0x260   : > { %v771_v37 = vmul.f32 %v1027_v1, %v664_v51  ;;  %v714_v35 = vadd.f32 %v1025_v53, %v713_v60  ;;  %vm776_vm1 = vweird.f32 %v1027_v1 }
 0x261   : > { %vm777_vm5 = vmor %vm775_vm4, %vm776_vm1 }
 0x262   : > { %v772_v6 = vsub.f32 1.0, %v771_v37  ;;  %v718_v59 = vsel %vm717_vm12, %v1025_v53, %v714_v35 }
 0x263   : > { %v723_v4 = vsel %vm720_vm15, %v722_v46, %v718_v59 }
 0x264   : > { %v724_v7 = vmul.f32 %v723_v4, %v1466_v28  ;;  %v773_v11 = vmul.f32 %v1027_v1, %v772_v6 }
 0x266   : > { %945 = vmatmul.msk.f32.gmra.mxu1 %vm280_vm2, %v724_v7  ;;  %v774_v16 = vadd.f32 %v1027_v1, %v773_v11 }
 0x268   : > { %v778_v25 = vsel %vm777_vm5, %v1027_v1, %v774_v16 }
 0x269   : > { %v783_v17 = vsel %vm780_vm6, %v782_v19, %v778_v25 }
 0x26a   : > { %v784_v28 = vmul.f32 %v783_v17, %v1471_v41 }
 0x26c   : > { %949 = vmatmul.msk.f32.gmra.mxu3 %vm280_vm2, %v784_v28 }
 0x26e   : > { %946 = vmatmul.msk.f32.gmra.mxu1 %vm280_vm2, %v739_v24 }
 0x2ba   : > { %v826_v26 = vpop.f32.mrf.mxu1 }
 0x2bb   : > { %850 = vst.msk [vmem:[%s145_s23] sm:$0xff] %vm157_vm0, %v826_v26 }
 0x2c8   : > { %v829_v15 = vpop.f32.mrf.mxu1 }
 0x2c9   : > { %851 = vst.msk [vmem:[%s145_s23 + $0x8] sm:$0xff] %vm157_vm0, %v829_v15 }
 0x2d6   : > { %v841_v29 = vpop.f32.mrf.mxu3 }
 0x2d7   : > { %855 = vst.msk [vmem:[%s145_s23 + $0x28] sm:$0xff] %vm157_vm0, %v841_v29 }
 0x2d9   : > { %v832_v41 = vpop.f32.mrf.mxu1 }
 0x2da   : > { %852 = vst.msk [vmem:[%s145_s23 + $0x10] sm:$0xff] %vm157_vm0, %v832_v41 }
 0x2de   : > { %v844_v5 = vpop.f32.mrf.mxu3 }
 0x2df   : > { %856 = vst.msk [vmem:[%s145_s23 + $0x30] sm:$0xff] %vm157_vm0, %v844_v5 }
 0x2e3   : > { %v835_v14 = vpop.f32.mrf.mxu1 }
 0x2e4   : > { %853 = vst.msk [vmem:[%s145_s23 + $0x18] sm:$0xff] %vm157_vm0, %v835_v14 }
 0x2eb   : > { %v838_v30 = vpop.f32.mrf.mxu1 }
 0x2ec   : > { %854 = vst.msk [vmem:[%s145_s23 + $0x20] sm:$0xff] %vm157_vm0, %v838_v30 }
 0x2ef   : > { %v847_v10 = vpop.f32.mrf.mxu3 }
 0x2f0   : > { %857 = vst.msk [vmem:[%s145_s23 + $0x38] sm:$0xff] %vm157_vm0, %v847_v10 }
 0x2f1 PF: > { %s12_s9 = sadd.s32 1, %s1034_s9  }
 0x2f2   : > { %p9_p4 = scmp.ge.s32.totalorder %s12_s9, 4  }
 0x2f4   :  { %11 = sbr.rel (!%p9_p4) target bundleno = 1 (0x1), region = 58 }

</bundles_post_ra>
